<compile_context>
chip_gen: v6e
topology: v6e:2x2x1
jax: 0.10.0
libtpu: 0.0.40
codegen_flags: <defaults>
</compile_context>

<pallas_src>
import functools
import math

import jax
import jax.numpy as jnp
import numpy as np
from jax.experimental import pallas as pl
from jax.experimental.pallas import tpu as pltpu


D_IN = 28 * 28      # 784
D_H1 = 128
D_H2 = 64
D_LAT = 32
D_LAT_PAD = 128     # lane-dense padded latent width


def _round_up(x, m):
    return (x + m - 1) // m * m


def _cdiv(a, b):
    return (a + b - 1) // b


# ----------------------------- Pallas kernel -------------------------------


def _autoencoder_kernel(x_ref,
                        w1_ref, b1_ref, w2_ref, b2_ref, w3_ref, b3_ref,
                        w4_ref, b4_ref, w5_ref, b5_ref, w6_ref, b6_ref,
                        enc_ref, dec_ref):
    bf16 = jnp.bfloat16
    x = x_ref[...]                                                    # (TB, 784) bf16

    # ---- encoder ----  (bf16 MXU operands, f32 accumulation & elementwise)
    h = jnp.dot(x, w1_ref[...], preferred_element_type=jnp.float32) + b1_ref[...]
    h = jnp.maximum(h, 0.0)                                           # (TB, 128) f32
    h = jnp.dot(h.astype(bf16), w2_ref[...],
                preferred_element_type=jnp.float32) + b2_ref[...]
    h = jnp.maximum(h, 0.0)                                           # (TB, 64) f32
    enc = jnp.dot(h.astype(bf16), w3_ref[...],
                  preferred_element_type=jnp.float32) + b3_ref[...]   # (TB, 128) f32
    enc_bf = enc.astype(bf16)
    enc_ref[...] = enc_bf                                             # lane-dense bf16 store

    # ---- decoder ----  (padded latent cols are zero, padded w4 rows are zero)
    d = jnp.dot(enc_bf, w4_ref[...],
                preferred_element_type=jnp.float32) + b4_ref[...]
    d = jnp.maximum(d, 0.0)                                           # (TB, 64) f32
    d = jnp.dot(d.astype(bf16), w5_ref[...],
                preferred_element_type=jnp.float32) + b5_ref[...]
    d = jnp.maximum(d, 0.0)                                           # (TB, 128) f32
    logits = jnp.dot(d.astype(bf16), w6_ref[...],
                     preferred_element_type=jnp.float32) + b6_ref[...]
    # numerically-stable sigmoid via tanh (runs on the EUP slot), f32 math
    dec_ref[...] = (0.5 * (jnp.tanh(0.5 * logits) + 1.0)).astype(dec_ref.dtype)


# ------------------------------- wrapper ------------------------------------


def _prep_mats(params):
    """PyTorch Linear convention: y = x @ W.T + b with W of shape (out, in).

    Transposes to (in, out), casts weights to bf16 (MXU operands / HBM
    traffic), keeps biases in f32, and zero-pads the latent dimension
    32 -> 128 (w3 output cols / b3 / w4 input rows) for lane-dense stores of
    the encoded output.
    """
    bf16 = jnp.bfloat16
    w1 = params["w1"].T.astype(bf16)                                            # (784, 128)
    w2 = params["w2"].T.astype(bf16)                                            # (128, 64)
    w3 = jnp.pad(params["w3"].T, ((0, 0), (0, D_LAT_PAD - D_LAT))).astype(bf16)  # (64, 128)
    w4 = jnp.pad(params["w4"].T, ((0, D_LAT_PAD - D_LAT), (0, 0))).astype(bf16)  # (128, 64)
    w5 = params["w5"].T.astype(bf16)                                            # (64, 128)
    w6 = params["w6"].T.astype(bf16)                                            # (128, 784)
    b1 = params["b1"].astype(jnp.float32).reshape(1, -1)
    b2 = params["b2"].astype(jnp.float32).reshape(1, -1)
    b3 = jnp.pad(params["b3"], (0, D_LAT_PAD - D_LAT)).astype(jnp.float32).reshape(1, -1)
    b4 = params["b4"].astype(jnp.float32).reshape(1, -1)
    b5 = params["b5"].astype(jnp.float32).reshape(1, -1)
    b6 = params["b6"].astype(jnp.float32).reshape(1, -1)
    return (w1, b1, w2, b2, w3, b3, w4, b4, w5, b5, w6, b6)


def _choose_tiling(B, block_rows):
    """Batch tile size / grid: multiple-of-8 tiles, padding waste < 8 rows per
    tile, and an even grid >= 2 when B > 8 so both v7x TensorCores get work."""
    if B <= 8:
        return 8, 1
    grid_n = max(2, _cdiv(B, block_rows))
    if grid_n % 2:
        grid_n += 1
    tb = _round_up(_cdiv(B, grid_n), 8)
    return tb, grid_n


def autoencoder_forward(x, params, *, block_rows=1024):
    """Returns (encoded (B, 32), decoded (B, 784)) like the PyTorch module.

    Outputs are bfloat16 (HBM-bandwidth-bound kernel: bf16 halves DMA traffic
    and uses the native bf16 MXU path on all generations).
    """
    B = x.shape[0]
    x2 = x.reshape(B, D_IN).astype(jnp.bfloat16)

    tb, grid_n = _choose_tiling(B, block_rows)
    b_pad = tb * grid_n
    if b_pad != B:
        x2 = jnp.pad(x2, ((0, b_pad - B), (0, 0)))

    mats = _prep_mats(params)

    def row_spec(n):
        return pl.BlockSpec((tb, n), lambda i: (i, 0))

    def full_spec(shape):
        return pl.BlockSpec(shape, lambda i: (0, 0))

    in_specs = [row_spec(D_IN)] + [full_spec(m.shape) for m in mats]
    out_specs = (row_spec(D_LAT_PAD), row_spec(D_IN))

    enc_pad, dec_pad = pl.pallas_call(
        _autoencoder_kernel,
        out_shape=(jax.ShapeDtypeStruct((b_pad, D_LAT_PAD), jnp.bfloat16),
                   jax.ShapeDtypeStruct((b_pad, D_IN), jnp.bfloat16)),
        grid=(grid_n,),
        in_specs=in_specs,
        out_specs=out_specs,
        compiler_params=pltpu.CompilerParams(
            dimension_semantics=("parallel",)),
    )(x2, *mats)

    return enc_pad[:B, :D_LAT], dec_pad[:B]


# --------------------------- plain-JAX reference -----------------------------


def autoencoder_reference(x, params):
    x2 = x.reshape(x.shape[0], D_IN).astype(jnp.float32)
    h = jnp.maximum(x2 @ params["w1"].T + params["b1"], 0.0)
    h = jnp.maximum(h @ params["w2"].T + params["b2"], 0.0)
    enc = h @ params["w3"].T + params["b3"]
    d = jnp.maximum(enc @ params["w4"].T + params["b4"], 0.0)
    d = jnp.maximum(d @ params["w5"].T + params["b5"], 0.0)
    dec = jax.nn.sigmoid(d @ params["w6"].T + params["b6"])
    return enc, dec


# --------------------------- deterministic params ----------------------------


def init_params(key):
    """PyTorch nn.Linear default init: U(-1/sqrt(fan_in), 1/sqrt(fan_in))."""
    def linear(k, out_f, in_f):
        kw, kb = jax.random.split(k)
        bound = 1.0 / math.sqrt(in_f)
        w = jax.random.uniform(kw, (out_f, in_f), jnp.float32, -bound, bound)
        b = jax.random.uniform(kb, (out_f,), jnp.float32, -bound, bound)
        return w, b

    dims = [(D_IN, D_H1), (D_H1, D_H2), (D_H2, D_LAT),
            (D_LAT, D_H2), (D_H2, D_H1), (D_H1, D_IN)]
    ks = jax.random.split(key, len(dims))
    params = {}
    for idx, ((din, dout), k) in enumerate(zip(dims, ks), start=1):
        w, b = linear(k, dout, din)
        params[f"w{idx}"] = w
        params[f"b{idx}"] = b
    return params


if __name__ == "__main__":
    key = jax.random.PRNGKey(0)
    pkey, xkey, xkey2 = jax.random.split(key, 3)
    params = init_params(pkey)

    fwd = jax.jit(functools.partial(autoencoder_forward, block_rows=1024))

    # Small MNIST-like flattened input: batch=2, 28*28=784 features.
    x = jax.random.uniform(xkey, (2, D_IN), jnp.float32)
    encoded, decoded = fwd(x, params)
    jax.block_until_ready((encoded, decoded))

    assert encoded.shape == (2, D_LAT), encoded.shape
    assert decoded.shape == (2, D_IN), decoded.shape

    # Cross-check against plain-JAX f32 math (bf16 kernel -> loosened tol).
    enc_ref, dec_ref = autoencoder_reference(x, params)
    np.testing.assert_allclose(np.asarray(encoded.astype(jnp.float32)),
                               np.asarray(enc_ref), rtol=2e-2, atol=2e-2)
    np.testing.assert_allclose(np.asarray(decoded.astype(jnp.float32)),
                               np.asarray(dec_ref), rtol=2e-2, atol=2e-2)

    # Second check exercising the multi-tile (even grid >= 2) path with a
    # non-multiple-of-8 batch, to validate the padding/tiling logic.
    xb = jax.random.uniform(xkey2, (300, D_IN), jnp.float32)
    enc_b, dec_b = fwd(xb, params)
    jax.block_until_ready((enc_b, dec_b))
    assert enc_b.shape == (300, D_LAT), enc_b.shape
    assert dec_b.shape == (300, D_IN), dec_b.shape
    enc_bref, dec_bref = autoencoder_reference(xb, params)
    np.testing.assert_allclose(np.asarray(enc_b.astype(jnp.float32)),
                               np.asarray(enc_bref), rtol=2e-2, atol=2e-2)
    np.testing.assert_allclose(np.asarray(dec_b.astype(jnp.float32)),
                               np.asarray(dec_bref), rtol=2e-2, atol=2e-2)

    print("KERNEL_OK")
</pallas_src>

<mosaic_0001>
module attributes {stable_mosaic.version = 11 : i64} {
  func.func @_autoencoder_kernel(%arg0: i32, %arg1: memref<8x784xbf16, #tpu.memory_space<vmem>>, %arg2: memref<784x128xbf16, #tpu.memory_space<vmem>>, %arg3: memref<1x128xf32, #tpu.memory_space<vmem>>, %arg4: memref<128x64xbf16, #tpu.memory_space<vmem>>, %arg5: memref<1x64xf32, #tpu.memory_space<vmem>>, %arg6: memref<64x128xbf16, #tpu.memory_space<vmem>>, %arg7: memref<1x128xf32, #tpu.memory_space<vmem>>, %arg8: memref<128x64xbf16, #tpu.memory_space<vmem>>, %arg9: memref<1x64xf32, #tpu.memory_space<vmem>>, %arg10: memref<64x128xbf16, #tpu.memory_space<vmem>>, %arg11: memref<1x128xf32, #tpu.memory_space<vmem>>, %arg12: memref<128x784xbf16, #tpu.memory_space<vmem>>, %arg13: memref<1x784xf32, #tpu.memory_space<vmem>>, %arg14: memref<8x128xbf16, #tpu.memory_space<vmem>>, %arg15: memref<8x784xbf16, #tpu.memory_space<vmem>>) attributes {dimension_semantics = [#tpu.dimension_semantics<parallel>], iteration_bounds = array<i64: 1>, scalar_prefetch = 0 : i64, scratch_operands = 0 : i64, tpu.core_type = #tpu.core_type<tc>, window_params = [{transform_indices = @transform_0, window_bounds = array<i64: 8, 784>}, {pipeline_mode = #tpu.pipeline_mode<synchronous>, transform_indices = @transform_1, window_bounds = array<i64: 784, 128>}, {pipeline_mode = #tpu.pipeline_mode<synchronous>, transform_indices = @transform_2, window_bounds = array<i64: 1, 128>}, {pipeline_mode = #tpu.pipeline_mode<synchronous>, transform_indices = @transform_3, window_bounds = array<i64: 128, 64>}, {pipeline_mode = #tpu.pipeline_mode<synchronous>, transform_indices = @transform_4, window_bounds = array<i64: 1, 64>}, {pipeline_mode = #tpu.pipeline_mode<synchronous>, transform_indices = @transform_5, window_bounds = array<i64: 64, 128>}, {pipeline_mode = #tpu.pipeline_mode<synchronous>, transform_indices = @transform_6, window_bounds = array<i64: 1, 128>}, {pipeline_mode = #tpu.pipeline_mode<synchronous>, transform_indices = @transform_7, window_bounds = array<i64: 128, 64>}, {pipeline_mode = #tpu.pipeline_mode<synchronous>, transform_indices = @transform_8, window_bounds = array<i64: 1, 64>}, {pipeline_mode = #tpu.pipeline_mode<synchronous>, transform_indices = @transform_9, window_bounds = array<i64: 64, 128>}, {pipeline_mode = #tpu.pipeline_mode<synchronous>, transform_indices = @transform_10, window_bounds = array<i64: 1, 128>}, {pipeline_mode = #tpu.pipeline_mode<synchronous>, transform_indices = @transform_11, window_bounds = array<i64: 128, 784>}, {pipeline_mode = #tpu.pipeline_mode<synchronous>, transform_indices = @transform_12, window_bounds = array<i64: 1, 784>}, {transform_indices = @transform_13, window_bounds = array<i64: 8, 128>}, {transform_indices = @transform_14, window_bounds = array<i64: 8, 784>}]} {
    %c0 = arith.constant 0 : index
    %c0_0 = arith.constant 0 : index
    %0 = vector.load %arg1[%c0, %c0_0] : memref<8x784xbf16, #tpu.memory_space<vmem>>, vector<8x784xbf16>
    %c0_1 = arith.constant 0 : index
    %c0_2 = arith.constant 0 : index
    %1 = vector.load %arg2[%c0_1, %c0_2] : memref<784x128xbf16, #tpu.memory_space<vmem>>, vector<784x128xbf16>
    %cst = arith.constant dense<0.000000e+00> : vector<8x128xf32>
    %2 = tpu.matmul %0, %1, %cst {dimension_numbers = #tpu.dot_dimension_numbers<[1], [0], [0], [1], [0, 0, 1, 1], [], []>} : vector<8x784xbf16>, vector<784x128xbf16>, vector<8x128xf32> -> vector<8x128xf32>
    %c0_3 = arith.constant 0 : index
    %c0_4 = arith.constant 0 : index
    %3 = vector.load %arg3[%c0_3, %c0_4] : memref<1x128xf32, #tpu.memory_space<vmem>>, vector<1x128xf32>
    %4 = vector.broadcast %3 : vector<1x128xf32> to vector<8x128xf32>
    %5 = arith.addf %2, %4 : vector<8x128xf32>
    %cst_5 = arith.constant 0.000000e+00 : f32
    %6 = vector.broadcast %cst_5 : f32 to vector<8x128xf32>
    %7 = arith.maximumf %5, %6 : vector<8x128xf32>
    %8 = arith.truncf %7 : vector<8x128xf32> to vector<8x128xbf16>
    %c0_6 = arith.constant 0 : index
    %c0_7 = arith.constant 0 : index
    %9 = vector.load %arg4[%c0_6, %c0_7] : memref<128x64xbf16, #tpu.memory_space<vmem>>, vector<128x64xbf16>
    %cst_8 = arith.constant dense<0.000000e+00> : vector<8x64xf32>
    %10 = tpu.matmul %8, %9, %cst_8 {dimension_numbers = #tpu.dot_dimension_numbers<[1], [0], [0], [1], [0, 0, 1, 1], [], []>} : vector<8x128xbf16>, vector<128x64xbf16>, vector<8x64xf32> -> vector<8x64xf32>
    %c0_9 = arith.constant 0 : index
    %c0_10 = arith.constant 0 : index
    %11 = vector.load %arg5[%c0_9, %c0_10] : memref<1x64xf32, #tpu.memory_space<vmem>>, vector<1x64xf32>
    %12 = vector.broadcast %11 : vector<1x64xf32> to vector<8x64xf32>
    %13 = arith.addf %10, %12 : vector<8x64xf32>
    %cst_11 = arith.constant 0.000000e+00 : f32
    %14 = vector.broadcast %cst_11 : f32 to vector<8x64xf32>
    %15 = arith.maximumf %13, %14 : vector<8x64xf32>
    %16 = arith.truncf %15 : vector<8x64xf32> to vector<8x64xbf16>
    %c0_12 = arith.constant 0 : index
    %c0_13 = arith.constant 0 : index
    %17 = vector.load %arg6[%c0_12, %c0_13] : memref<64x128xbf16, #tpu.memory_space<vmem>>, vector<64x128xbf16>
    %cst_14 = arith.constant dense<0.000000e+00> : vector<8x128xf32>
    %18 = tpu.matmul %16, %17, %cst_14 {dimension_numbers = #tpu.dot_dimension_numbers<[1], [0], [0], [1], [0, 0, 1, 1], [], []>} : vector<8x64xbf16>, vector<64x128xbf16>, vector<8x128xf32> -> vector<8x128xf32>
    %c0_15 = arith.constant 0 : index
    %c0_16 = arith.constant 0 : index
    %19 = vector.load %arg7[%c0_15, %c0_16] : memref<1x128xf32, #tpu.memory_space<vmem>>, vector<1x128xf32>
    %20 = vector.broadcast %19 : vector<1x128xf32> to vector<8x128xf32>
    %21 = arith.addf %18, %20 : vector<8x128xf32>
    %22 = arith.truncf %21 : vector<8x128xf32> to vector<8x128xbf16>
    %c0_17 = arith.constant 0 : index
    %c0_18 = arith.constant 0 : index
    %23 = vector.load %arg14[%c0_17, %c0_18] : memref<8x128xbf16, #tpu.memory_space<vmem>>, vector<8x128xbf16>
    tpu.vector_store %arg14[%c0_17, %c0_18], %22 {strides = array<i32>} : memref<8x128xbf16, #tpu.memory_space<vmem>>, vector<8x128xbf16>,
    %c0_19 = arith.constant 0 : index
    %c0_20 = arith.constant 0 : index
    %24 = vector.load %arg8[%c0_19, %c0_20] : memref<128x64xbf16, #tpu.memory_space<vmem>>, vector<128x64xbf16>
    %cst_21 = arith.constant dense<0.000000e+00> : vector<8x64xf32>
    %25 = tpu.matmul %22, %24, %cst_21 {dimension_numbers = #tpu.dot_dimension_numbers<[1], [0], [0], [1], [0, 0, 1, 1], [], []>} : vector<8x128xbf16>, vector<128x64xbf16>, vector<8x64xf32> -> vector<8x64xf32>
    %c0_22 = arith.constant 0 : index
    %c0_23 = arith.constant 0 : index
    %26 = vector.load %arg9[%c0_22, %c0_23] : memref<1x64xf32, #tpu.memory_space<vmem>>, vector<1x64xf32>
    %27 = vector.broadcast %26 : vector<1x64xf32> to vector<8x64xf32>
    %28 = arith.addf %25, %27 : vector<8x64xf32>
    %cst_24 = arith.constant 0.000000e+00 : f32
    %29 = vector.broadcast %cst_24 : f32 to vector<8x64xf32>
    %30 = arith.maximumf %28, %29 : vector<8x64xf32>
    %31 = arith.truncf %30 : vector<8x64xf32> to vector<8x64xbf16>
    %c0_25 = arith.constant 0 : index
    %c0_26 = arith.constant 0 : index
    %32 = vector.load %arg10[%c0_25, %c0_26] : memref<64x128xbf16, #tpu.memory_space<vmem>>, vector<64x128xbf16>
    %cst_27 = arith.constant dense<0.000000e+00> : vector<8x128xf32>
    %33 = tpu.matmul %31, %32, %cst_27 {dimension_numbers = #tpu.dot_dimension_numbers<[1], [0], [0], [1], [0, 0, 1, 1], [], []>} : vector<8x64xbf16>, vector<64x128xbf16>, vector<8x128xf32> -> vector<8x128xf32>
    %c0_28 = arith.constant 0 : index
    %c0_29 = arith.constant 0 : index
    %34 = vector.load %arg11[%c0_28, %c0_29] : memref<1x128xf32, #tpu.memory_space<vmem>>, vector<1x128xf32>
    %35 = vector.broadcast %34 : vector<1x128xf32> to vector<8x128xf32>
    %36 = arith.addf %33, %35 : vector<8x128xf32>
    %cst_30 = arith.constant 0.000000e+00 : f32
    %37 = vector.broadcast %cst_30 : f32 to vector<8x128xf32>
    %38 = arith.maximumf %36, %37 : vector<8x128xf32>
    %39 = arith.truncf %38 : vector<8x128xf32> to vector<8x128xbf16>
    %c0_31 = arith.constant 0 : index
    %c0_32 = arith.constant 0 : index
    %40 = vector.load %arg12[%c0_31, %c0_32] : memref<128x784xbf16, #tpu.memory_space<vmem>>, vector<128x784xbf16>
    %cst_33 = arith.constant dense<0.000000e+00> : vector<8x784xf32>
    %41 = tpu.matmul %39, %40, %cst_33 {dimension_numbers = #tpu.dot_dimension_numbers<[1], [0], [0], [1], [0, 0, 1, 1], [], []>} : vector<8x128xbf16>, vector<128x784xbf16>, vector<8x784xf32> -> vector<8x784xf32>
    %c0_34 = arith.constant 0 : index
    %c0_35 = arith.constant 0 : index
    %42 = vector.load %arg13[%c0_34, %c0_35] : memref<1x784xf32, #tpu.memory_space<vmem>>, vector<1x784xf32>
    %43 = vector.broadcast %42 : vector<1x784xf32> to vector<8x784xf32>
    %44 = arith.addf %41, %43 : vector<8x784xf32>
    %cst_36 = arith.constant 5.000000e-01 : f32
    %45 = vector.broadcast %cst_36 : f32 to vector<8x784xf32>
    %46 = arith.mulf %45, %44 : vector<8x784xf32>
    %47 = math.tanh %46 : vector<8x784xf32>
    %cst_37 = arith.constant 1.000000e+00 : f32
    %48 = vector.broadcast %cst_37 : f32 to vector<8x784xf32>
    %49 = arith.addf %47, %48 : vector<8x784xf32>
    %cst_38 = arith.constant 5.000000e-01 : f32
    %50 = vector.broadcast %cst_38 : f32 to vector<8x784xf32>
    %51 = arith.mulf %50, %49 : vector<8x784xf32>
    %52 = arith.truncf %51 : vector<8x784xf32> to vector<8x784xbf16>
    %c0_39 = arith.constant 0 : index
    %c0_40 = arith.constant 0 : index
    %53 = vector.load %arg15[%c0_39, %c0_40] : memref<8x784xbf16, #tpu.memory_space<vmem>>, vector<8x784xbf16>
    tpu.vector_store %arg15[%c0_39, %c0_40], %52 {strides = array<i32>} : memref<8x784xbf16, #tpu.memory_space<vmem>>, vector<8x784xbf16>,
    return
  }
  func.func @transform_0(%arg0: i32) -> (i32, i32) {
    %c0_i32 = arith.constant 0 : i32
    %c0_i32_0 = arith.constant 0 : i32
    return %arg0, %c0_i32 : i32, i32
  }
  func.func @transform_1(%arg0: i32) -> (i32, i32) {
    %c0_i32 = arith.constant 0 : i32
    %c0_i32_0 = arith.constant 0 : i32
    %c0_i32_1 = arith.constant 0 : i32
    return %c0_i32, %c0_i32_0 : i32, i32
  }
  func.func @transform_2(%arg0: i32) -> (i32, i32) {
    %c0_i32 = arith.constant 0 : i32
    %c0_i32_0 = arith.constant 0 : i32
    %c0_i32_1 = arith.constant 0 : i32
    return %c0_i32, %c0_i32_0 : i32, i32
  }
  func.func @transform_3(%arg0: i32) -> (i32, i32) {
    %c0_i32 = arith.constant 0 : i32
    %c0_i32_0 = arith.constant 0 : i32
    %c0_i32_1 = arith.constant 0 : i32
    return %c0_i32, %c0_i32_0 : i32, i32
  }
  func.func @transform_4(%arg0: i32) -> (i32, i32) {
    %c0_i32 = arith.constant 0 : i32
    %c0_i32_0 = arith.constant 0 : i32
    %c0_i32_1 = arith.constant 0 : i32
    return %c0_i32, %c0_i32_0 : i32, i32
  }
  func.func @transform_5(%arg0: i32) -> (i32, i32) {
    %c0_i32 = arith.constant 0 : i32
    %c0_i32_0 = arith.constant 0 : i32
    %c0_i32_1 = arith.constant 0 : i32
    return %c0_i32, %c0_i32_0 : i32, i32
  }
  func.func @transform_6(%arg0: i32) -> (i32, i32) {
    %c0_i32 = arith.constant 0 : i32
    %c0_i32_0 = arith.constant 0 : i32
    %c0_i32_1 = arith.constant 0 : i32
    return %c0_i32, %c0_i32_0 : i32, i32
  }
  func.func @transform_7(%arg0: i32) -> (i32, i32) {
    %c0_i32 = arith.constant 0 : i32
    %c0_i32_0 = arith.constant 0 : i32
    %c0_i32_1 = arith.constant 0 : i32
    return %c0_i32, %c0_i32_0 : i32, i32
  }
  func.func @transform_8(%arg0: i32) -> (i32, i32) {
    %c0_i32 = arith.constant 0 : i32
    %c0_i32_0 = arith.constant 0 : i32
    %c0_i32_1 = arith.constant 0 : i32
    return %c0_i32, %c0_i32_0 : i32, i32
  }
  func.func @transform_9(%arg0: i32) -> (i32, i32) {
    %c0_i32 = arith.constant 0 : i32
    %c0_i32_0 = arith.constant 0 : i32
    %c0_i32_1 = arith.constant 0 : i32
    return %c0_i32, %c0_i32_0 : i32, i32
  }
  func.func @transform_10(%arg0: i32) -> (i32, i32) {
    %c0_i32 = arith.constant 0 : i32
    %c0_i32_0 = arith.constant 0 : i32
    %c0_i32_1 = arith.constant 0 : i32
    return %c0_i32, %c0_i32_0 : i32, i32
  }
  func.func @transform_11(%arg0: i32) -> (i32, i32) {
    %c0_i32 = arith.constant 0 : i32
    %c0_i32_0 = arith.constant 0 : i32
    %c0_i32_1 = arith.constant 0 : i32
    return %c0_i32, %c0_i32_0 : i32, i32
  }
  func.func @transform_12(%arg0: i32) -> (i32, i32) {
    %c0_i32 = arith.constant 0 : i32
    %c0_i32_0 = arith.constant 0 : i32
    %c0_i32_1 = arith.constant 0 : i32
    return %c0_i32, %c0_i32_0 : i32, i32
  }
  func.func @transform_13(%arg0: i32) -> (i32, i32) {
    %c0_i32 = arith.constant 0 : i32
    %c0_i32_0 = arith.constant 0 : i32
    return %arg0, %c0_i32 : i32, i32
  }
  func.func @transform_14(%arg0: i32) -> (i32, i32) {
    %c0_i32 = arith.constant 0 : i32
    %c0_i32_0 = arith.constant 0 : i32
    return %arg0, %c0_i32 : i32, i32
  }
}

</mosaic_0001>

<bundles_post_ra>
// kernel: autoencoder_forward.1
= control target key start
LH: loop header
LB: loop body
LE: loop exit
PB: predicated region body
PF: predicated region fallthrough
CT: control target
= control target key end

     0   :  { %v2181_v41 = vmov 0.0   ;;  %vm2182_vm0 = vmmov 0   ;;  %vm474_vm1 = vcmask 130048   ;;  %vm792_vm2 = vcmask 523264   ;;  %s2738_s1 = inlined_call_operand.vmem [shape: bf16[784,128], index: 1, kind: input, shape index: {}]   ;;  %s2739_s0 = inlined_call_operand.vmem [shape: bf16[8,784], index: 0, kind: input, shape index: {}]   ;;  %s2740_s3 = inlined_call_operand.vmem [shape: bf16[128,64], index: 3, kind: input, shape index: {}]   ;;  %s2741_s5 = inlined_call_operand.vmem [shape: bf16[64,128], index: 5, kind: input, shape index: {}]   ;;  %s2742_s2 = inlined_call_operand.vmem [shape: f32[1,128], index: 2, kind: input, shape index: {}]   ;;  %s2743_s7 = inlined_call_operand.vmem [shape: bf16[128,64], index: 7, kind: input, shape index: {}]   ;;  %s2744_s4 = inlined_call_operand.vmem [shape: f32[1,64], index: 4, kind: input, shape index: {}]   ;;  %s2745_s9 = inlined_call_operand.vmem [shape: bf16[64,128], index: 9, kind: input, shape index: {}]   ;;  %s2746_s6 = inlined_call_operand.vmem [shape: f32[1,128], index: 6, kind: input, shape index: {}]   ;;  %s2747_s13 = inlined_call_operand.vmem [shape: bf16[8,128], index: 13, kind: output, shape index: {0}]   ;;  %s2748_s11 = inlined_call_operand.vmem [shape: bf16[128,784], index: 11, kind: input, shape index: {}]   ;;  %s2749_s8 = inlined_call_operand.vmem [shape: f32[1,64], index: 8, kind: input, shape index: {}]   ;;  %s2750_s10 = inlined_call_operand.vmem [shape: f32[1,128], index: 10, kind: input, shape index: {}]   ;;  %s2751_s12 = inlined_call_operand.vmem [shape: f32[1,784], index: 12, kind: input, shape index: {}]   ;;  %s2752_s14 = inlined_call_operand.vmem [shape: bf16[8,784], index: 14, kind: output, shape index: {1}]  }
   0x1   :  { %v2007_v0 = vld [vmem:[%s2738_s1 + $0x78] sm:$0xff]   ;;  %v2011_v4 = vld [vmem:[%s2738_s1 + $0x70] sm:$0xff]   ;;  %v2015_v8 = vld [vmem:[%s2738_s1 + $0x68] sm:$0xff]   ;;  %vm1647_vm3 = vcmask 125952  }
   0x2   :  { %v2008_v1 = vld [vmem:[%s2738_s1 + $0x38] sm:$0xff]   ;;  %1809 = vmatprep.subr.bf16.mxu0 %v2007_v0  ;;  %v2012_v5 = vld [vmem:[%s2738_s1 + $0x30] sm:$0xff]   ;;  %v2016_v9 = vld [vmem:[%s2738_s1 + $0x28] sm:$0xff]  }
   0x3   :  { %v2009_v2 = vld [vmem:[%s2738_s1 + $0xf8] sm:$0xff]   ;;  %1810 = vmatpush3.bf16.msra.mxu0 %v2008_v1  ;;  %v2013_v6 = vld [vmem:[%s2738_s1 + $0xf0] sm:$0xff]   ;;  %v2017_v10 = vld [vmem:[%s2738_s1 + $0xe8] sm:$0xff]  }
   0x4   :  { %v2010_v3 = vld [vmem:[%s2738_s1 + $0xb8] sm:$0xff]   ;;  %1831 = vmatprep.subr.bf16.mxu1 %v2009_v2  ;;  %1811 = vmatprep.subr.bf16.mxu0 %v2011_v4  ;;  %v2014_v7 = vld [vmem:[%s2738_s1 + $0xb0] sm:$0xff]   ;;  %v2018_v11 = vld [vmem:[%s2738_s1 + $0xa8] sm:$0xff]  }
   0x5   :  { %1832 = vmatpush3.bf16.msra.mxu1 %v2010_v3  ;;  %v2019_v12 = vld [vmem:[%s2738_s1 + $0x60] sm:$0xff]   ;;  %v2023_v16 = vld [vmem:[%s2738_s1 + $0x58] sm:$0xff]   ;;  %v2027_v20 = vld [vmem:[%s2738_s1 + $0x50] sm:$0xff]  }
   0x6   :  { %1833 = vmatprep.subr.bf16.mxu1 %v2013_v6  ;;  %v2020_v13 = vld [vmem:[%s2738_s1 + $0x20] sm:$0xff]   ;;  %v2024_v17 = vld [vmem:[%s2738_s1 + $0x18] sm:$0xff]   ;;  %v2028_v21 = vld [vmem:[%s2738_s1 + $0x10] sm:$0xff]  }
   0x7   :  { %1812 = vmatpush3.bf16.msra.mxu0 %v2012_v5  ;;  %v2021_v14 = vld [vmem:[%s2738_s1 + $0xe0] sm:$0xff]   ;;  %v2025_v18 = vld [vmem:[%s2738_s1 + $0xd8] sm:$0xff]   ;;  %v2029_v22 = vld [vmem:[%s2738_s1 + $0xd0] sm:$0xff]  }
   0x8   :  { %1813 = vmatprep.subr.bf16.mxu0 %v2015_v8  ;;  %v2022_v15 = vld [vmem:[%s2738_s1 + $0xa0] sm:$0xff]   ;;  %v2026_v19 = vld [vmem:[%s2738_s1 + $0x98] sm:$0xff]   ;;  %v2030_v23 = vld [vmem:[%s2738_s1 + $0x90] sm:$0xff]  }
   0x9   :  { %1834 = vmatpush3.bf16.msra.mxu1 %v2014_v7  ;;  %v2031_v24 = vld [vmem:[%s2738_s1 + $0x48] sm:$0xff]   ;;  %v2035_v28 = vld [vmem:[%s2738_s1 + $0x40] sm:$0xff]   ;;  %v2042_v35 = vld [vmem:[%s2738_s1 + $0x178] sm:$0xff]  }
   0xa   :  { %1835 = vmatprep.subr.bf16.mxu1 %v2017_v10  ;;  %v2032_v25 = vld [vmem:[%s2738_s1 + $0x8] sm:$0xff]   ;;  %v2036_v29 = vld [vmem:[%s2738_s1] sm:$0xff]   ;;  %v2045_v39 = vld [vmem:[%s2738_s1 + $0x138] sm:$0xff]  }
   0xb   :  { %1814 = vmatpush3.bf16.msra.mxu0 %v2016_v9  ;;  %v2033_v26 = vld [vmem:[%s2738_s1 + $0xc8] sm:$0xff]   ;;  %v2037_v30 = vld [vmem:[%s2738_s1 + $0xc0] sm:$0xff]   ;;  %v2046_v40 = vld [vmem:[%s2738_s1 + $0x170] sm:$0xff]  }
   0xc   :  { %1815 = vmatprep.subr.bf16.mxu0 %v2019_v12  ;;  %v2034_v27 = vld [vmem:[%s2738_s1 + $0x88] sm:$0xff]   ;;  %v47_v31 = vld [vmem:[%s2739_s0] sm:$0xff]  ;;  %v2047_v42 = vld [vmem:[%s2738_s1 + $0x130] sm:$0xff]  }
   0xd   :  { %1836 = vmatpush3.bf16.msra.mxu1 %v2018_v11  ;;  %v1658_v32 = vcombine.low %v47_v31, %v47_v31  ;;  %v1659_v33 = vcombine.high %v47_v31, %v47_v31  ;;  %v2041_v34 = vld [vmem:[%s2738_s1 + $0x80] sm:$0xff]   ;;  %v48_v36 = vld [vmem:[%s2739_s0 + $0x8] sm:$0xff]  ;;  %v2052_v47 = vld [vmem:[%s2738_s1 + $0x158] sm:$0xff]  }
   0xe   :  { %1837 = vmatprep.subr.bf16.mxu1 %v2021_v14  ;;  %v1660_v37 = vcombine.low %v48_v36, %v48_v36  ;;  %v1661_v38 = vcombine.high %v48_v36, %v48_v36  ;;  %v2048_v43 = vld [vmem:[%s2738_s1 + $0x168] sm:$0xff]   ;;  %v2050_v45 = vld [vmem:[%s2738_s1 + $0x160] sm:$0xff]   ;;  %v2053_v48 = vld [vmem:[%s2738_s1 + $0x118] sm:$0xff]  }
   0xf   :  { %1816 = vmatpush3.bf16.msra.mxu0 %v2020_v13  ;;  %510 = vmatprep.mubr.bf16.mxu0 %v1659_v33  ;;  %v2049_v44 = vld [vmem:[%s2738_s1 + $0x128] sm:$0xff]   ;;  %v2051_v46 = vld [vmem:[%s2738_s1 + $0x120] sm:$0xff]   ;;  %v2054_v49 = vld [vmem:[%s2738_s1 + $0x150] sm:$0xff]  }
  0x10   :  { %1817 = vmatprep.subr.bf16.mxu0 %v2023_v16  ;;  %550 = vmatprep.mubr.bf16.mxu1 %v1661_v38  ;;  %v2060_v50 = vld [vmem:[%s2738_s1 + $0x180] sm:$0xff]   ;;  %v49_v51 = vld [vmem:[%s2739_s0 + $0x10] sm:$0xff]  ;;  %v2040_v52 = vld [vmem:[%s2739_s0 + $0x18] ss:$0 sps:$4 sm:$0xff]  }
  0x11   :  { %1838 = vmatpush3.bf16.msra.mxu1 %v2022_v15  ;;  %v1663_v53 = vcombine.high %v49_v51, %v49_v51  ;;  %v2055_v54 = vld [vmem:[%s2738_s1 + $0x110] sm:$0xff]   ;;  %v2056_v55 = vld [vmem:[%s2738_s1 + $0x148] sm:$0xff]   ;;  %v2058_v57 = vld [vmem:[%s2738_s1 + $0x140] sm:$0xff]   ;;  %v1662_v59 = vcombine.low %v49_v51, %v49_v51 }
  0x12   :  { %1839 = vmatprep.subr.bf16.mxu1 %v2025_v18  ;;  %v2057_v56 = vld [vmem:[%s2738_s1 + $0x108] sm:$0xff]   ;;  %v2059_v58 = vld [vmem:[%s2738_s1 + $0x100] sm:$0xff]   ;;  %v2063_v60 = vld [vmem:[%s2740_s3 + $0x38] sm:$0xff]  }
  0x13   :  { %1818 = vmatpush3.bf16.msra.mxu0 %v2024_v17  ;;  %v2064_v61 = vld [vmem:[%s2740_s3 + $0x30] sm:$0xff]   ;;  %v2065_v62 = vld [vmem:[%s2740_s3 + $0x28] sm:$0xff]   ;;  %v2066_v63 = vld [vmem:[%s2740_s3 + $0x20] sm:$0xff]  }
  0x14   :  { %1819 = vmatprep.subr.bf16.mxu0 %v2027_v20  ;;  %v2067_v0 = vld [vmem:[%s2740_s3 + $0x18] sm:$0xff]   ;;  %v2068_v1 = vld [vmem:[%s2740_s3 + $0x10] sm:$0xff]   ;;  %v2069_v2 = vld [vmem:[%s2740_s3 + $0x8] sm:$0xff]  }
  0x15   :  { %1840 = vmatpush3.bf16.msra.mxu1 %v2026_v19  ;;  %v2070_v3 = vld [vmem:[%s2740_s3] sm:$0xff]   ;;  %v2071_v4 = vld [vmem:[%s2741_s5 + $0x18] sm:$0xff]   ;;  %v2072_v5 = vld [vmem:[%s2741_s5 + $0x10] sm:$0xff]  }
  0x16   :  { %1841 = vmatprep.subr.bf16.mxu1 %v2029_v22  ;;  %v1657_v19 = vld [vmem:[%s2742_s2] ss:$0 sm:$0xff]  ;;  %v2077_v36 = vld [vmem:[%s2743_s7 + $0x28] sm:$0xff]   ;;  %v2079_v38 = vld [vmem:[%s2743_s7 + $0x18] sm:$0xff]  }
  0x17   :  { %1820 = vmatpush3.bf16.msra.mxu0 %v2028_v21  ;;  %v2074_v33 = vld [vmem:[%s2741_s5] sm:$0xff]   ;;  %v2083_v51 = vld [vmem:[%s2745_s9 + $0x18] sm:$0xff]  }
  0x18   :  { %1821 = vmatprep.subr.bf16.mxu0 %v2031_v24 }
  0x19   :  { %1842 = vmatpush3.bf16.msra.mxu1 %v2030_v23 }
  0x1a   :  { %1843 = vmatprep.subr.bf16.mxu1 %v2033_v26 }
  0x1b   :  { %1822 = vmatpush3.bf16.msra.mxu0 %v2032_v25 }
  0x1c   :  { %1823 = vmatprep.subr.bf16.mxu0 %v2035_v28 }
  0x1d   :  { %1844 = vmatpush3.bf16.msra.mxu1 %v2034_v27 }
  0x1e   :  { %1845 = vmatprep.subr.bf16.mxu1 %v2037_v30 }
  0x1f   :  { %1824 = vmatpush3.bf16.msra.mxu0 %v2036_v29 }
  0x20   :  { %1853 = vmatprep.subr.bf16.mxu0 %v2042_v35  ;;  %v2076_v35 = vld [vmem:[%s2743_s7 + $0x30] sm:$0xff]  }
  0x21   :  { %1846 = vmatpush3.bf16.msra.mxu1 %v2041_v34  ;;  %v2075_v34 = vld [vmem:[%s2743_s7 + $0x38] sm:$0xff]  }
  0x22   :  { %511 = vmatmul.mubr.bf16.vlgmr.msra.gmra.mxu0 %v1658_v32  ;;  %1914 = vmatprep.subr.bf16.mxu1 %v2181_v41  ;;  %v2073_v32 = vld [vmem:[%s2741_s5 + $0x8] sm:$0xff]  }
  0x23   :  { %1854 = vmatpush3.bf16.msra.mxu0 %v2045_v39  ;;  %590 = vmatprep.mubr.bf16.mxu0 %v1663_v53  ;;  %v2080_v39 = vld [vmem:[%s2743_s7 + $0x10] sm:$0xff]   ;;  %v1724_v53 = vld [vmem:[%s2746_s6] ss:$0 sm:$0xff] }
  0x24   :  { %551 = vmatmul.mubr.bf16.vlgmr.msra.gmra.mxu1 %v1660_v37  ;;  %1855 = vmatprep.subr.bf16.mxu0 %v2046_v40  ;;  %v2078_v37 = vld [vmem:[%s2743_s7 + $0x20] sm:$0xff]   ;;  %v2081_v40 = vld [vmem:[%s2743_s7 + $0x8] sm:$0xff]  }
  0x25   :  { %1916 = vmatprep.mubr.msk.bf16.mxu1 %vm2182_vm0, %v2181_v41  ;;  %1915 = vmatpush3.bf16.msra.mxu1 %v2060_v50  ;;  %v2082_v50 = vld [vmem:[%s2743_s7] sm:$0xff]  }
  0x26   :  { %1920 = vmatprep.subr.bf16.mxu1 %v2181_v41 }
  0x27   :  { %1856 = vmatpush3.bf16.msra.mxu0 %v2047_v42  ;;  %v1715_v42 = vld [vmem:[%s2744_s4] ss:$0 sm:$0xff] }
  0x28   :  { %1857 = vmatprep.subr.bf16.mxu0 %v2048_v43 }
  0x2b   :  { %1858 = vmatpush3.bf16.msra.mxu0 %v2049_v44 }
  0x2c   :  { %1859 = vmatprep.subr.bf16.mxu0 %v2050_v45  ;;  %1917 = vmatmul.mubr.msk.bf16.vlgmr.msra.gmra.mxu1 %vm474_vm1, %v2040_v52  ;;  %v2084_v52 = vld [vmem:[%s2745_s9 + $0x10] sm:$0xff]  }
  0x2d   :  { %1936 = vmatprep.mubr.msk.bf16.mxu1 %vm2182_vm0, %v2181_v41  ;;  %1921 = vmatpush3.bf16.msra.mxu1 %v2063_v60  ;;  %v2085_v60 = vld [vmem:[%s2745_s9 + $0x8] sm:$0xff]  }
  0x2e   :  { %1922 = vmatprep.subr.bf16.mxu1 %v2181_v41 }
  0x2f   :  { %1860 = vmatpush3.bf16.msra.mxu0 %v2051_v46 }
  0x30   :  { %1861 = vmatprep.subr.bf16.mxu0 %v2052_v47 }
  0x31   :  { %1923 = vmatpush3.bf16.msra.mxu1 %v2064_v61  ;;  %v2086_v61 = vld [vmem:[%s2745_s9] sm:$0xff]  }
  0x32   :  { %1924 = vmatprep.subr.bf16.mxu1 %v2181_v41 }
  0x33   :  { %1862 = vmatpush3.bf16.msra.mxu0 %v2053_v48 }
  0x34   :  { %1863 = vmatprep.subr.bf16.mxu0 %v2054_v49 }
  0x35   :  { %1925 = vmatpush3.bf16.msra.mxu1 %v2065_v62  ;;  %v2089_v62 = vld [vmem:[%s2748_s11 + $0x18c] ss:$28 sps:$4 sm:$0xff]  }
  0x36   :  { %1926 = vmatprep.subr.bf16.mxu1 %v2181_v41 }
  0x37   :  { %1864 = vmatpush3.bf16.msra.mxu0 %v2055_v54 }
  0x38   :  { %1865 = vmatprep.subr.bf16.mxu0 %v2056_v55 }
  0x39   :  { %1927 = vmatpush3.bf16.msra.mxu1 %v2066_v63  ;;  %v2090_v63 = vld [vmem:[%s2748_s11 + $0x190] ss:$28 sps:$4 sm:$0xff]  }
  0x3a   :  { %1928 = vmatprep.subr.bf16.mxu1 %v2181_v41 }
  0x3b   :  { %1866 = vmatpush3.bf16.msra.mxu0 %v2057_v56 }
  0x3c   :  { %1867 = vmatprep.subr.bf16.mxu0 %v2058_v57 }
  0x3d   :  { %1929 = vmatpush3.bf16.msra.mxu1 %v2067_v0  ;;  %v2092_v0 = vld [vmem:[%s2748_s11 + $0x194] ss:$28 sps:$4 sm:$0xff]  }
  0x3e   :  { %1930 = vmatprep.subr.bf16.mxu1 %v2181_v41 }
  0x3f   :  { %1868 = vmatpush3.bf16.msra.mxu0 %v2059_v58 }
  0x40   :  { %1940 = vmatprep.subr.bf16.mxu0 %v2181_v41 }
  0x41   :  { %1931 = vmatpush3.bf16.msra.mxu1 %v2068_v1  ;;  %v2096_v1 = vld [vmem:[%s2748_s11 + $0x158] ss:$28 sps:$4 sm:$0xff]  }
  0x42   :  { %591 = vmatmul.mubr.bf16.vlgmr.msra.gmra.mxu0 %v1662_v59  ;;  %1932 = vmatprep.subr.bf16.mxu1 %v2181_v41 }
  0x43   :  { %1948 = vmatprep.mubr.msk.bf16.mxu0 %vm2182_vm0, %v2181_v41  ;;  %1941 = vmatpush3.bf16.msra.mxu0 %v2071_v4  ;;  %v2102_v4 = vld [vmem:[%s2748_s11 + $0x120] ss:$28 sps:$4 sm:$0xff]  }
  0x44   :  { %1942 = vmatprep.subr.bf16.mxu0 %v2181_v41 }
  0x45   :  { %1933 = vmatpush3.bf16.msra.mxu1 %v2069_v2  ;;  %v2098_v2 = vld [vmem:[%s2748_s11 + $0x15c] ss:$28 sps:$4 sm:$0xff]  }
  0x46   :  { %1934 = vmatprep.subr.bf16.mxu1 %v2181_v41 }
  0x47   :  { %1943 = vmatpush3.bf16.msra.mxu0 %v2072_v5  ;;  %v2110_v5 = vld [vmem:[%s2748_s11 + $0xec] ss:$28 sps:$4 sm:$0xff]  }
  0x48   :  { %1944 = vmatprep.subr.bf16.mxu0 %v2181_v41 }
  0x49   :  { %1935 = vmatpush3.bf16.msra.mxu1 %v2070_v3  ;;  %v2104_v3 = vld [vmem:[%s2748_s11 + $0x124] ss:$28 sps:$4 sm:$0xff]  }
  0x4a   :  { %1952 = vmatprep.subr.bf16.mxu1 %v2181_v41 }
  0x4b   :  { %1945 = vmatpush3.bf16.msra.mxu0 %v2073_v32  ;;  %v2125_v32 = vld [vmem:[%s2748_s11 + $0x3c] ss:$28 sps:$4 sm:$0xff]  }
  0x4c   :  { %1946 = vmatprep.subr.bf16.mxu0 %v2181_v41 }
  0x4f   :  { %1947 = vmatpush3.bf16.msra.mxu0 %v2074_v33  ;;  %v2123_v33 = vld [vmem:[%s2748_s11 + $0x38] ss:$28 sps:$4 sm:$0xff]  }
  0x50   :  { %1972 = vmatprep.subr.bf16.mxu0 %v2181_v41 }
  0xe2   :  { %v1825_v6 = vpop.f32.mrf.mxu0 }
  0xe4   :  { %v1826_v7 = vpop.f32.mrf.mxu0  ;;  %v1847_v8 = vpop.f32.mrf.mxu1 }
  0xe5   :  { %v1827_v18 = vadd.f32 %v1826_v7, %v1825_v6  ;;  %v2108_v6 = vld [vmem:[%s2748_s11 + $0xe8] ss:$28 sps:$4 sm:$0xff]   ;;  %v2116_v7 = vld [vmem:[%s2748_s11 + $0xb4] ss:$28 sps:$4 sm:$0xff]  }
  0xe6   :  { %v1828_v9 = vpop.f32.mrf.mxu0  ;;  %v1848_v10 = vpop.f32.mrf.mxu1 }
  0xe7   :  { %v513_v20 = vadd.f32 %v1827_v18, %v1657_v19  ;;  %v1849_v21 = vadd.f32 %v1848_v10, %v1847_v8  ;;  %v2114_v8 = vld [vmem:[%s2748_s11 + $0xb0] ss:$28 sps:$4 sm:$0xff]   ;;  %v2122_v9 = vld [vmem:[%s2748_s11 + $0x7c] ss:$28 sps:$4 sm:$0xff]   ;;  %v2087_v19 = vld [vmem:[%s2748_s11 + $0x188] ss:$28 sps:$4 sm:$0xff]  }
  0xe8   :  { %v1829_v11 = vpop.f32.mrf.mxu0  ;;  %v1850_v12 = vpop.f32.mrf.mxu1  ;;  %v2120_v10 = vld [vmem:[%s2748_s11 + $0x78] ss:$28 sps:$4 sm:$0xff]  }
  0xe9   :  { %v553_v24 = vadd.f32 %v1849_v21, %v513_v20  ;;  %v2128_v11 = vld [vmem:[%s2748_s11 + $0x44] ss:$28 sps:$4 sm:$0xff]   ;;  %v2095_v21 = vld [vmem:[%s2748_s11 + $0x154] ss:$28 sps:$4 sm:$0xff]  }
  0xea   :  { %v1851_v13 = vpop.f32.mrf.mxu1  ;;  %v2126_v12 = vld [vmem:[%s2748_s11 + $0x40] ss:$28 sps:$4 sm:$0xff]  }
  0xeb   :  { %v1730_v13 = vld [vmem:[%s2749_s8] ss:$0 sm:$0xff] }
  0xec   :  { %v632_v14 = vpop.f32.mrf.mxu1 }
  0xee   :  { %v1918_v15 = vpop.f32.mrf.mxu1 }
  0xf0   :  { %v635_v16 = vpop.f32.mrf.mxu1 }
  0xf2   :  { %v1919_v17 = vpop.f32.mrf.mxu1 }
 0x102   :  { %v1869_v22 = vpop.f32.mrf.mxu0 }
 0x104   :  { %v1870_v23 = vpop.f32.mrf.mxu0 }
 0x105   :  { %v1871_v25 = vadd.f32 %v1870_v23, %v1869_v22  ;;  %v2093_v23 = vld [vmem:[%s2748_s11 + $0x150] ss:$28 sps:$4 sm:$0xff]  }
 0x106   :  { %v1872_v26 = vpop.f32.mrf.mxu0 }
 0x107   :  { %v593_v27 = vadd.f32 %v1871_v25, %v553_v24  ;;  %v2101_v24 = vld [vmem:[%s2748_s11 + $0x11c] ss:$28 sps:$4 sm:$0xff]   ;;  %v2107_v26 = vld [vmem:[%s2748_s11 + $0xe4] ss:$28 sps:$4 sm:$0xff]  }
 0x108   :  { %v1873_v28 = vpop.f32.mrf.mxu0  ;;  %v2099_v25 = vld [vmem:[%s2748_s11 + $0x118] ss:$28 sps:$4 sm:$0xff]  }
 0x109   :  { %v633_v29 = vadd.f32 %v632_v14, %v593_v27  ;;  %v2105_v27 = vld [vmem:[%s2748_s11 + $0xe0] ss:$28 sps:$4 sm:$0xff]   ;;  %v2113_v28 = vld [vmem:[%s2748_s11 + $0xac] ss:$28 sps:$4 sm:$0xff]  }
 0x10b   :  { %v638_v30 = vmax.f32 %v633_v29, 0.0  ;;  %v2111_v29 = vld [vmem:[%s2748_s11 + $0xa8] ss:$28 sps:$4 sm:$0xff]  }
 0x10d   :  { %v639_v31 = vpack.c.bf16 %v638_v30, %v638_v30  ;;  %v2119_v30 = vld [vmem:[%s2748_s11 + $0x74] ss:$28 sps:$4 sm:$0xff]  }
 0x10f   :  { %1937 = vmatmul.mubr.bf16.vlgmr.msra.gmra.mxu1 %v639_v31  ;;  %v2117_v31 = vld [vmem:[%s2748_s11 + $0x70] ss:$28 sps:$4 sm:$0xff]  }
 0x110   :  { %1968 = vmatprep.mubr.msk.bf16.mxu1 %vm2182_vm0, %v2181_v41  ;;  %1953 = vmatpush3.bf16.msra.mxu1 %v2075_v34  ;;  %v2131_v34 = vld [vmem:[%s2748_s11 + $0x4] ss:$28 sps:$4 sm:$0xff]  }
 0x111   :  { %1954 = vmatprep.subr.bf16.mxu1 %v2181_v41 }
 0x114   :  { %1955 = vmatpush3.bf16.msra.mxu1 %v2076_v35  ;;  %v2134_v35 = vld [vmem:[%s2748_s11 + $0xc] ss:$28 sps:$4 sm:$0xff]  }
 0x115   :  { %1956 = vmatprep.subr.bf16.mxu1 %v2181_v41 }
 0x118   :  { %1957 = vmatpush3.bf16.msra.mxu1 %v2077_v36  ;;  %v2129_v36 = vld [vmem:[%s2748_s11] ss:$28 sps:$4 sm:$0xff]  }
 0x119   :  { %1958 = vmatprep.subr.bf16.mxu1 %v2181_v41 }
 0x11c   :  { %1959 = vmatpush3.bf16.msra.mxu1 %v2078_v37  ;;  %v2132_v37 = vld [vmem:[%s2748_s11 + $0x8] ss:$28 sps:$4 sm:$0xff]  }
 0x11d   :  { %1960 = vmatprep.subr.bf16.mxu1 %v2181_v41 }
 0x120   :  { %1961 = vmatpush3.bf16.msra.mxu1 %v2079_v38  ;;  %v2137_v38 = vld [vmem:[%s2748_s11 + $0x19c] ss:$28 sps:$4 sm:$0xff]  }
 0x121   :  { %1962 = vmatprep.subr.bf16.mxu1 %v2181_v41 }
 0x124   :  { %1963 = vmatpush3.bf16.msra.mxu1 %v2080_v39  ;;  %v2183_v39 = vmov 0  }
 0x125   :  { %1964 = vmatprep.subr.bf16.mxu1 %v2181_v41 }
 0x128   :  { %1965 = vmatpush3.bf16.msra.mxu1 %v2081_v40  ;;  %v1739_v40 = vld [vmem:[%s2750_s10] ss:$0 sm:$0xff] }
 0x129   :  { %1966 = vmatprep.subr.bf16.mxu1 %v2181_v41 }
 0x12c   :  { %1967 = vmatpush3.bf16.msra.mxu1 %v2082_v50  ;;  %v2141_v50 = vld [vmem:[%s2748_s11 + $0x164] ss:$28 sps:$4 sm:$0xff]  }
 0x12d   :  { %1465 = vmatprep.subr.bf16.mxu1 %v2092_v0  ;;  %v2155_v0 = vld [vmem:[%s2748_s11 + $0x80] ss:$28 sps:$4 sm:$0xff]  }
 0x1cf   :  { %v745_v43 = vpop.f32.mrf.mxu1 }
 0x1d0   :  { %v746_v44 = vadd.f32 %v1715_v42, %v745_v43 }
 0x1d1   :  { %v1938_v45 = vpop.f32.mrf.mxu1 }
 0x1d2   :  { %v751_v46 = vmax.f32 %v746_v44, 0.0 }
 0x1d3   :  { %v748_v47 = vpop.f32.mrf.mxu1 }
 0x1d4   :  { %v752_v48 = vpack.c.bf16 %v751_v46, %v751_v46  ;;  %v2135_v47 = vld [vmem:[%s2748_s11 + $0x198] ss:$28 sps:$4 sm:$0xff]  }
 0x1d5   :  { %v1939_v49 = vpop.f32.mrf.mxu1 }
 0x1d6   :  { %1949 = vmatmul.mubr.msk.bf16.vlgmr.msra.gmra.mxu0 %vm792_vm2, %v752_v48  ;;  %v2138_v48 = vld [vmem:[%s2748_s11 + $0x1a0] ss:$28 sps:$4 sm:$0xff]  }
 0x1d7   :  { %1980 = vmatprep.mubr.msk.bf16.mxu0 %vm2182_vm0, %v2181_v41  ;;  %1973 = vmatpush3.bf16.msra.mxu0 %v2083_v51 }
 0x1d8   :  { %1974 = vmatprep.subr.bf16.mxu0 %v2181_v41 }
 0x1db   :  { %1975 = vmatpush3.bf16.msra.mxu0 %v2084_v52  ;;  %v2139_v52 = vld [vmem:[%s2748_s11 + $0x160] ss:$28 sps:$4 sm:$0xff]  }
 0x1dc   :  { %1976 = vmatprep.subr.bf16.mxu0 %v2181_v41 }
 0x1df   :  { %1977 = vmatpush3.bf16.msra.mxu0 %v2085_v60  ;;  %v2153_v60 = vld [vmem:[%s2748_s11 + $0xbc] ss:$28 sps:$4 sm:$0xff]  }
 0x1e0   :  { %1978 = vmatprep.subr.bf16.mxu0 %v2181_v41 }
 0x1e3   :  { %1979 = vmatpush3.bf16.msra.mxu0 %v2086_v61  ;;  %v2151_v61 = vld [vmem:[%s2748_s11 + $0xb8] ss:$28 sps:$4 sm:$0xff]  }
 0x1e4   :  { %1424 = vmatprep.subr.bf16.mxu0 %v2089_v62  ;;  %v2154_v62 = vld [vmem:[%s2748_s11 + $0xc0] ss:$28 sps:$4 sm:$0xff]  }
 0x296   :  { %v830_v54 = vpop.f32.mrf.mxu0 }
 0x297   :  { %v831_v55 = vadd.f32 %v1724_v53, %v830_v54  ;;  %v2142_v53 = vld [vmem:[%s2748_s11 + $0x168] ss:$28 sps:$4 sm:$0xff]  }
 0x298   :  { %v1950_v56 = vpop.f32.mrf.mxu0  ;;  %v2145_v54 = vld [vmem:[%s2748_s11 + $0x12c] ss:$28 sps:$4 sm:$0xff]  }
 0x299   :  { %v836_v57 = vpack.c.bf16 %v831_v55, %v831_v55  ;;  %v2143_v55 = vld [vmem:[%s2748_s11 + $0x128] ss:$28 sps:$4 sm:$0xff]   ;;  %v2146_v56 = vld [vmem:[%s2748_s11 + $0x130] ss:$28 sps:$4 sm:$0xff]  }
 0x29a   :  { %v833_v58 = vpop.f32.mrf.mxu0 }
 0x29b   :  { %837 = vst [vmem:[%s2747_s13] sm:$0xf] %v836_v57  ;;  %1969 = vmatmul.mubr.bf16.vlgmr.msra.gmra.mxu1 %v836_v57  ;;  %v2149_v57 = vld [vmem:[%s2748_s11 + $0xf4] ss:$28 sps:$4 sm:$0xff]  }
 0x29c   :  { %v1951_v59 = vpop.f32.mrf.mxu0  ;;  %1466 = vmatpush1.bf16.msra.mxu1 %v2090_v63  ;;  %1497 = vmatprep.mubr.bf16.mxu1 %v2183_v39  ;;  %v2147_v58 = vld [vmem:[%s2748_s11 + $0xf0] ss:$28 sps:$4 sm:$0xff]   ;;  %v2157_v63 = vld [vmem:[%s2748_s11 + $0x84] ss:$28 sps:$4 sm:$0xff]  }
 0x29d   :  { %1467 = vmatprep.subr.bf16.mxu1 %v2098_v2  ;;  %v2150_v59 = vld [vmem:[%s2748_s11 + $0xf8] ss:$28 sps:$4 sm:$0xff]   ;;  %v2161_v2 = vld [vmem:[%s2748_s11 + $0x4c] ss:$28 sps:$4 sm:$0xff]  }
 0x2a0   :  { %1468 = vmatpush1.bf16.msra.mxu1 %v2096_v1  ;;  %v2158_v1 = vld [vmem:[%s2748_s11 + $0x88] ss:$28 sps:$4 sm:$0xff]  }
 0x2a1   :  { %1469 = vmatprep.subr.bf16.mxu1 %v2104_v3  ;;  %v2159_v3 = vld [vmem:[%s2748_s11 + $0x48] ss:$28 sps:$4 sm:$0xff]  }
 0x2a4   :  { %1470 = vmatpush1.bf16.msra.mxu1 %v2102_v4  ;;  %v2162_v4 = vld [vmem:[%s2748_s11 + $0x50] ss:$28 sps:$4 sm:$0xff]  }
 0x2a5   :  { %1471 = vmatprep.subr.bf16.mxu1 %v2110_v5  ;;  %v2165_v5 = vld [vmem:[%s2748_s11 + $0x14] ss:$28 sps:$4 sm:$0xff]  }
 0x2a8   :  { %1472 = vmatpush1.bf16.msra.mxu1 %v2108_v6  ;;  %v2163_v6 = vld [vmem:[%s2748_s11 + $0x10] ss:$28 sps:$4 sm:$0xff]  }
 0x2a9   :  { %1473 = vmatprep.subr.bf16.mxu1 %v2116_v7  ;;  %v2166_v7 = vld [vmem:[%s2748_s11 + $0x18] ss:$28 sps:$4 sm:$0xff]  }
 0x2ac   :  { %1474 = vmatpush1.bf16.msra.mxu1 %v2114_v8  ;;  %v1101_v8 = vlaneseq }
 0x2ad   :  { %1475 = vmatprep.subr.bf16.mxu1 %v2122_v9 }
 0x2ae   :  { %v1102_v9 = vshrl.u32 %v1101_v8, 7 }
 0x2b0   :  { %1476 = vmatpush1.bf16.msra.mxu1 %v2120_v10  ;;  %v1103_v10 = vsub.s32 0, %v1102_v9 }
 0x2b1   :  { %1477 = vmatprep.subr.bf16.mxu1 %v2128_v11  ;;  %v1111_v11 = vsub.s32 2, %v1102_v9 }
 0x2b4   :  { %1478 = vmatpush1.bf16.msra.mxu1 %v2126_v12  ;;  %v1099_v12 = vld [vmem:[%s2751_s12] sm:$0x7f] }
 0x2b5   :  { %1479 = vmatprep.subr.bf16.mxu1 %v2134_v35 }
 0x2b8   :  { %1480 = vmatpush1.bf16.msra.mxu1 %v2132_v37 }
 0x2b9   :  { %1984 = vmatprep.subr.bf16.mxu1 %v2181_v41 }
 0x35b   :  { %v943_v14 = vpop.f32.mrf.mxu1 }
 0x35c   :  { %v944_v15 = vadd.f32 %v1730_v13, %v943_v14  ;;  %v1107_v13 = vsub.s32 1, %v1102_v9  ;;  %v1115_v14 = vsub.s32 3, %v1102_v9 }
 0x35d   :  { %v1970_v16 = vpop.f32.mrf.mxu1 }
 0x35e   :  { %v949_v17 = vmax.f32 %v944_v15, 0.0  ;;  %v1104_v15 = vrot.slane %v1099_v12, %v1103_v10  ;;  %v1112_v16 = vrot.slane %v1099_v12, %v1111_v11 }
 0x35f   :  { %v946_v18 = vpop.f32.mrf.mxu1 }
 0x360   :  { %v950_v20 = vpack.c.bf16 %v949_v17, %v949_v17  ;;  %v1108_v17 = vrot.slane %v1099_v12, %v1107_v13  ;;  %v1116_v18 = vrot.slane %v1099_v12, %v1115_v14 }
 0x361   :  { %v1971_v22 = vpop.f32.mrf.mxu1 }
 0x362   :  { %1981 = vmatmul.mubr.msk.bf16.vlgmr.msra.gmra.mxu0 %vm792_vm2, %v950_v20 }
 0x363   :  { %1425 = vmatpush1.bf16.msra.mxu0 %v2087_v19  ;;  %1456 = vmatprep.mubr.bf16.mxu0 %v2183_v39 }
 0x364   :  { %1426 = vmatprep.subr.bf16.mxu0 %v2095_v21 }
 0x367   :  { %1427 = vmatpush1.bf16.msra.mxu0 %v2093_v23 }
 0x368   :  { %1428 = vmatprep.subr.bf16.mxu0 %v2101_v24 }
 0x36b   :  { %1429 = vmatpush1.bf16.msra.mxu0 %v2099_v25 }
 0x36c   :  { %1430 = vmatprep.subr.bf16.mxu0 %v2107_v26 }
 0x36f   :  { %1431 = vmatpush1.bf16.msra.mxu0 %v2105_v27 }
 0x370   :  { %1432 = vmatprep.subr.bf16.mxu0 %v2113_v28 }
 0x373   :  { %1433 = vmatpush1.bf16.msra.mxu0 %v2111_v29 }
 0x374   :  { %1434 = vmatprep.subr.bf16.mxu0 %v2119_v30 }
 0x377   :  { %1435 = vmatpush1.bf16.msra.mxu0 %v2117_v31 }
 0x378   :  { %1436 = vmatprep.subr.bf16.mxu0 %v2125_v32 }
 0x37b   :  { %1437 = vmatpush1.bf16.msra.mxu0 %v2123_v33 }
 0x37c   :  { %1438 = vmatprep.subr.bf16.mxu0 %v2131_v34 }
 0x37f   :  { %1439 = vmatpush1.bf16.msra.mxu0 %v2129_v36 }
 0x380   :  { %1506 = vmatprep.subr.bf16.mxu0 %v2137_v38 }
 0x422   :  { %v1027_v42 = vpop.f32.mrf.mxu0 }
 0x423   :  { %v1028_v43 = vadd.f32 %v1739_v40, %v1027_v42 }
 0x424   :  { %v1982_v44 = vpop.f32.mrf.mxu0 }
 0x425   :  { %v1033_v45 = vmax.f32 %v1028_v43, 0.0 }
 0x426   :  { %v1030_v46 = vpop.f32.mrf.mxu0 }
 0x427   :  { %v1034_v49 = vpack.c.bf16 %v1033_v45, %v1033_v45 }
 0x428   :  { %v1983_v51 = vpop.f32.mrf.mxu0 }
 0x429   :  { %1457 = vmatmul.mubr.bf16.vlgmr.msra.gmra.mxu0 %v1034_v49  ;;  %1498 = vmatmul.mubr.bf16.vlgmr.msra.gmra.mxu1 %v1034_v49  ;;  %v1123_v51 = vsub.s32 5, %v1102_v9 }
 0x42a   :  { %1507 = vmatpush1.bf16.msra.mxu0 %v2135_v47  ;;  %1985 = vmatpush3.bf16.msra.mxu1 %v2138_v48  ;;  %v1119_v48 = vsub.s32 4, %v1102_v9 }
 0x42b   :  { %1508 = vmatprep.subr.bf16.mxu0 %v2141_v50  ;;  %1986 = vmatprep.subr.bf16.mxu1 %v2181_v41 }
 0x42c   :  { %1538 = vmatprep.mubr.bf16.mxu0 %v2183_v39  ;;  %2000 = vmatprep.mubr.msk.bf16.mxu1 %vm2182_vm0, %v2181_v41 }
 0x42e   :  { %1509 = vmatpush1.bf16.msra.mxu0 %v2139_v52  ;;  %1987 = vmatpush3.bf16.msra.mxu1 %v2142_v53  ;;  %v1120_v52 = vrot.slane %v1099_v12, %v1119_v48 }
 0x42f   :  { %1510 = vmatprep.subr.bf16.mxu0 %v2145_v54  ;;  %1988 = vmatprep.subr.bf16.mxu1 %v2181_v41  ;;  %v1124_v54 = vrot.slane %v1099_v12, %v1123_v51 }
 0x432   :  { %1511 = vmatpush1.bf16.msra.mxu0 %v2143_v55  ;;  %1989 = vmatpush3.bf16.msra.mxu1 %v2146_v56 }
 0x433   :  { %1512 = vmatprep.subr.bf16.mxu0 %v2149_v57  ;;  %1990 = vmatprep.subr.bf16.mxu1 %v2181_v41 }
 0x436   :  { %1513 = vmatpush1.bf16.msra.mxu0 %v2147_v58  ;;  %1991 = vmatpush3.bf16.msra.mxu1 %v2150_v59 }
 0x437   :  { %1514 = vmatprep.subr.bf16.mxu0 %v2153_v60  ;;  %1992 = vmatprep.subr.bf16.mxu1 %v2181_v41 }
 0x43a   :  { %1515 = vmatpush1.bf16.msra.mxu0 %v2151_v61  ;;  %1993 = vmatpush3.bf16.msra.mxu1 %v2154_v62 }
 0x43b   :  { %1516 = vmatprep.subr.bf16.mxu0 %v2157_v63  ;;  %1994 = vmatprep.subr.bf16.mxu1 %v2181_v41 }
 0x43e   :  { %1517 = vmatpush1.bf16.msra.mxu0 %v2155_v0  ;;  %1995 = vmatpush3.bf16.msra.mxu1 %v2158_v1 }
 0x43f   :  { %1518 = vmatprep.subr.bf16.mxu0 %v2161_v2  ;;  %1996 = vmatprep.subr.bf16.mxu1 %v2181_v41 }
 0x442   :  { %1519 = vmatpush1.bf16.msra.mxu0 %v2159_v3  ;;  %1997 = vmatpush3.bf16.msra.mxu1 %v2162_v4 }
 0x443   :  { %1520 = vmatprep.subr.bf16.mxu0 %v2165_v5  ;;  %1998 = vmatprep.subr.bf16.mxu1 %v2181_v41 }
 0x446   :  { %1521 = vmatpush1.bf16.msra.mxu0 %v2163_v6  ;;  %1999 = vmatpush3.bf16.msra.mxu1 %v2166_v7 }
 0x449   :  { %1539 = vmatmul.mubr.bf16.vlgmr.msra.gmra.mxu0 %v1034_v49  ;;  %2001 = vmatmul.mubr.bf16.vlgmr.msra.gmra.mxu1 %v1034_v49  ;;  %v1127_v49 = vsub.s32 6, %v1102_v9 }
 0x44b   :  { %v1128_v53 = vrot.slane %v1099_v12, %v1127_v49 }
 0x4e9   :  { %v1458_v19 = vpop.f32.mrf.mxu0  ;;  %v1499_v41 = vpop.f32.mrf.mxu1 }
 0x4ea   :  { %v1459_v20 = vadd.f32 %v1458_v19, %v1104_v15  ;;  %v1500_v21 = vadd.f32 %v1499_v41, %v1112_v16 }
 0x4eb   :  { %v1460_v22 = vpop.f32.mrf.mxu0  ;;  %v1501_v23 = vpop.f32.mrf.mxu1 }
 0x4ec   :  { %v1587_v24 = vmul.f32 0.5, %v1459_v20  ;;  %v1589_v25 = vmul.f32 0.5, %v1500_v21  ;;  %v1461_v26 = vadd.f32 %v1460_v22, %v1108_v17  ;;  %v1502_v27 = vadd.f32 %v1501_v23, %v1116_v18 }
 0x4ed   :  { %v1462_v28 = vpop.f32.mrf.mxu0  ;;  %v1503_v29 = vpop.f32.mrf.mxu1 }
 0x4ee   :  { %2167 = vtanh.f32 %v1587_v24  ;;  %v1588_v30 = vmul.f32 0.5, %v1461_v26  ;;  %v1590_v31 = vmul.f32 0.5, %v1502_v27 }
 0x4ef   :  { %2169 = vtanh.f32 %v1589_v25  ;;  %v1463_v32 = vpop.f32.mrf.mxu0  ;;  %v1504_v33 = vpop.f32.mrf.mxu1 }
 0x4f0   :  { %2171 = vtanh.f32 %v1588_v30 }
 0x4f1   :  { %2173 = vtanh.f32 %v1590_v31 }
 0x4fb   :  { %v2168_v34 = vpop.eup %2167 }
 0x4fc   :  { %v2170_v35 = vpop.eup %2169  ;;  %v1601_v36 = vadd.f32 1.0, %v2168_v34 }
 0x4fd   :  { %v2172_v37 = vpop.eup %2171  ;;  %v1603_v38 = vadd.f32 1.0, %v2170_v35 }
 0x4fe   :  { %v2174_v39 = vpop.eup %2173  ;;  %v1602_v40 = vadd.f32 1.0, %v2172_v37  ;;  %v1608_v43 = vmul.f32 0.5, %v1601_v36 }
 0x4ff   :  { %v1604_v42 = vadd.f32 1.0, %v2174_v39  ;;  %v1610_v45 = vmul.f32 0.5, %v1603_v38 }
 0x500   :  { %v1609_v44 = vmul.f32 0.5, %v1602_v40 }
 0x501   :  { %v1611_v46 = vmul.f32 0.5, %v1604_v42 }
 0x502   :  { %v1805_v47 = vpack.c.bf16 %v1609_v44, %v1608_v43 }
 0x503   :  { %v1806_v50 = vpack.c.bf16 %v1611_v46, %v1610_v45 }
 0x504   :  { %1644 = vst [vmem:[%s2752_s14] sm:$0xff] %v1805_v47 }
 0x505   :  { %1645 = vst [vmem:[%s2752_s14 + $0x8] sm:$0xff] %v1806_v50 }
 0x509   :  { %v1540_v55 = vpop.f32.mrf.mxu0  ;;  %v1581_v56 = vpop.f32.mrf.mxu1 }
 0x50a   :  { %v1541_v57 = vadd.f32 %v1540_v55, %v1120_v52  ;;  %v1582_v58 = vadd.f32 %v1581_v56, %v1128_v53 }
 0x50b   :  { %v1542_v59 = vpop.f32.mrf.mxu0  ;;  %v2002_v60 = vpop.f32.mrf.mxu1 }
 0x50c   :  { %v1591_v61 = vmul.f32 0.5, %v1541_v57  ;;  %v1593_v62 = vmul.f32 0.5, %v1582_v58  ;;  %v1543_v63 = vadd.f32 %v1542_v59, %v1124_v54 }
 0x50d   :  { %v1544_v0 = vpop.f32.mrf.mxu0  ;;  %v1584_v1 = vpop.f32.mrf.mxu1 }
 0x50e   :  { %2175 = vtanh.f32 %v1591_v61  ;;  %v1592_v2 = vmul.f32 0.5, %v1543_v63 }
 0x50f   :  { %2177 = vtanh.f32 %v1593_v62  ;;  %v1545_v3 = vpop.f32.mrf.mxu0  ;;  %v2003_v4 = vpop.f32.mrf.mxu1 }
 0x510   :  { %2179 = vtanh.f32 %v1592_v2 }
 0x51b   :  { %v2176_v5 = vpop.eup %2175 }
 0x51c   :  { %v2178_v6 = vpop.eup %2177  ;;  %v1605_v7 = vadd.f32 1.0, %v2176_v5 }
 0x51d   :  { %v2180_v8 = vpop.eup %2179  ;;  %v1607_v9 = vadd.f32 1.0, %v2178_v6 }
 0x51e   :  { %v1606_v10 = vadd.f32 1.0, %v2180_v8  ;;  %v1612_v12 = vmul.f32 0.5, %v1605_v7 }
 0x51f   :  { %v1614_v11 = vmul.f32 0.5, %v1607_v9 }
 0x520   :  { %v1613_v13 = vmul.f32 0.5, %v1606_v10 }
 0x521   :  { %v1808_v14 = vpack.c.bf16 %v1614_v11, %v1614_v11 }
 0x522   :  { %v1807_v15 = vpack.c.bf16 %v1613_v13, %v1612_v12 }
 0x523   :  { %1648 = vst.msk [vmem:[%s2752_s14 + $0x18] sm:$0xf] %vm1647_vm3, %v1808_v14 }
 0x524   :  { %1646 = vst [vmem:[%s2752_s14 + $0x10] sm:$0xff] %v1807_v15 }

</bundles_post_ra>
